<compile_context>
chip_gen: v7x
topology: tpu7x:2x2x1
jax: 0.10.0
libtpu: 0.0.40
codegen_flags: <defaults>
</compile_context>

<pallas_src>
import functools

import jax
import jax.numpy as jnp
from jax.experimental import pallas as pl
from jax.experimental.pallas import tpu as pltpu

_MIB = 1024 * 1024


# ---------------------------------------------------------------------------
# Kernels
# ---------------------------------------------------------------------------

def _ffn_single_kernel(x_ref, gamma_ref, beta_ref, w1_ref, b1_ref, w2_ref,
                       b2_ref, o_ref, *, eps):
    """Whole hidden dim resident: LN -> Linear -> GELU -> Linear in one pass."""
    x = x_ref[...].astype(jnp.float32)
    mean = jnp.mean(x, axis=-1, keepdims=True)
    xc = x - mean
    var = jnp.mean(xc * xc, axis=-1, keepdims=True)
    xn = xc * jax.lax.rsqrt(var + eps)
    xn = xn * gamma_ref[...].astype(jnp.float32) \
         + beta_ref[...].astype(jnp.float32)

    h = jnp.dot(xn.astype(w1_ref.dtype), w1_ref[...],
                preferred_element_type=jnp.float32)
    h = h + b1_ref[...].astype(jnp.float32)
    # Exact (erf) GELU, matching nn.GELU() default.
    h = 0.5 * h * (1.0 + jax.lax.erf(h * 0.7071067811865476))
    # Dropout(p=0.0) is the identity.
    y = jnp.dot(h.astype(w2_ref.dtype), w2_ref[...],
                preferred_element_type=jnp.float32)
    y = y + b2_ref[...].astype(jnp.float32)
    o_ref[...] = y.astype(o_ref.dtype)


def _ffn_streamed_kernel(x_ref, gamma_ref, beta_ref, w1_ref, b1_ref, w2_ref,
                         b2_ref, o_ref, xn_ref, acc_ref, *, eps):
    """Hidden dim streamed in chunks along the inner ("arbitrary") grid axis."""
    j = pl.program_id(1)
    nj = pl.num_programs(1)

    @pl.when(j == 0)
    def _():
        # LayerNorm once per row tile, f32 stats, cached in matmul dtype.
        x = x_ref[...].astype(jnp.float32)
        mean = jnp.mean(x, axis=-1, keepdims=True)
        xc = x - mean
        var = jnp.mean(xc * xc, axis=-1, keepdims=True)
        xn = xc * jax.lax.rsqrt(var + eps)
        xn = xn * gamma_ref[...].astype(jnp.float32) \
             + beta_ref[...].astype(jnp.float32)
        xn_ref[...] = xn.astype(xn_ref.dtype)

    # Linear(dim -> hidden chunk) with f32 accumulation.
    h = jnp.dot(xn_ref[...], w1_ref[...], preferred_element_type=jnp.float32)
    h = h + b1_ref[...].astype(jnp.float32)
    # Exact (erf) GELU; Dropout(p=0.0) is identity.
    h = 0.5 * h * (1.0 + jax.lax.erf(h * 0.7071067811865476))
    # Partial Linear(hidden chunk -> dim).
    partial = jnp.dot(h.astype(w2_ref.dtype), w2_ref[...],
                      preferred_element_type=jnp.float32)

    @pl.when(j == 0)
    def _():
        acc_ref[...] = partial          # overwrite: no zero-fill pass

    @pl.when(j != 0)
    def _():
        acc_ref[...] += partial

    @pl.when(j == nj - 1)
    def _():
        y = acc_ref[...] + b2_ref[...].astype(jnp.float32)
        o_ref[...] = y.astype(o_ref.dtype)


# ---------------------------------------------------------------------------
# Tile / VMEM sizing helpers
# ---------------------------------------------------------------------------

def _vmem_budget_bytes():
    """Per-core VMEM budget with headroom for Mosaic internal scratch."""
    phys = None
    try:
        info = pltpu.get_tpu_info()
        phys = getattr(info, "vmem_capacity_bytes", None)
    except Exception:
        phys = None
    if not phys:
        phys = 64 * _MIB  # conservative: v7x per-TensorCore VMEM
    return int(phys * 0.8)


def _vmem_estimate(tm, th, dim, hidden, x_item, w_item, streamed):
    h_eff = th if streamed else hidden
    est = 0
    est += 2 * tm * dim * x_item            # x row tile (double-buffered)
    est += 2 * tm * dim * x_item            # output row tile
    est += 2 * dim * h_eff * w_item         # W1 (chunk or full)
    est += 2 * h_eff * dim * w_item         # W2 (chunk or full)
    est += 2 * (3 * dim + h_eff) * max(w_item, 4)   # gamma/beta/b1/b2 slabs
    est += 2 * tm * max(h_eff, dim) * 4     # f32 intermediates (h / partials)
    if streamed:
        est += tm * dim * 4                 # f32 output accumulator scratch
        est += tm * dim * w_item            # cached LayerNorm rows
    return est


def _round_down(v, m):
    return max(m, (v // m) * m)


def _select_tiles(n_rows, dim, hidden, x_item, w_item, budget, tile_m, tile_h):
    tm_t = _round_down(int(tile_m), 128)
    th_t = _round_down(int(tile_h), 128)
    tm = n_rows if n_rows <= tm_t else tm_t
    streamed = hidden > th_t
    th = th_t if streamed else hidden

    def fits(tm_, th_, streamed_):
        return _vmem_estimate(tm_, th_, dim, hidden, x_item, w_item,
                              streamed_) <= budget

    while not fits(tm, th, streamed):
        if not streamed and hidden > 128:
            # Resident weights too big -> switch to streaming the hidden dim.
            streamed = True
            th = min(th_t, _round_down(hidden, 128))
        elif streamed and th > 128 and th >= tm:
            th = _round_down(th // 2, 128)
        elif tm > 128:
            tm = _round_down(tm // 2, 128)
        elif streamed and th > 128:
            th = _round_down(th // 2, 128)
        elif tm > 8:
            tm = max(8, ((tm // 2) // 8) * 8)
        else:
            break
    return tm, th, streamed


# ---------------------------------------------------------------------------
# Wrapper
# ---------------------------------------------------------------------------

def feedforward_pallas(x, gamma, beta, w1, b1, w2, b2, *, eps=1e-5,
                       tile_m=512, tile_h=1024, vmem_limit_bytes=None):
    """x: (..., dim). Returns same shape/dtype as x. w1:(dim,hidden), w2:(hidden,dim)."""
    orig_shape = x.shape
    dim = orig_shape[-1]
    hidden = w1.shape[1]
    x2 = x.reshape(-1, dim)
    n_rows = x2.shape[0]

    x_item = x.dtype.itemsize
    w_item = w1.dtype.itemsize

    budget = (_vmem_budget_bytes() if vmem_limit_bytes is None
              else int(vmem_limit_bytes))

    tm, th, streamed = _select_tiles(n_rows, dim, hidden, x_item, w_item,
                                     budget, tile_m, tile_h)

    # Megacore (v7x): if the whole problem fits one row tile but is large,
    # split it so the "parallel" row axis shards across both TensorCores.
    if n_rows >= 256 and pl.cdiv(n_rows, tm) == 1:
        half = (n_rows + 1) // 2
        tm = max(128, ((half + 7) // 8) * 8)

    n_row_tiles = int(pl.cdiv(n_rows, tm))

    gamma2 = gamma.reshape(1, dim)
    beta2 = beta.reshape(1, dim)
    b2_2 = b2.reshape(1, dim)

    if (not streamed) or th >= hidden:
        # ------------- single-pass: whole hidden dim resident -------------
        b1_2 = b1.reshape(1, hidden)
        cost = pl.CostEstimate(
            flops=int(4 * n_rows * dim * hidden + 18 * n_rows * (dim + hidden)),
            transcendentals=int(n_rows * hidden),
            bytes_accessed=int(2 * n_rows * dim * x_item
                               + 2 * dim * hidden * w_item
                               + (3 * dim + hidden) * w_item),
        )
        out = pl.pallas_call(
            functools.partial(_ffn_single_kernel, eps=eps),
            out_shape=jax.ShapeDtypeStruct((n_rows, dim), x.dtype),
            grid_spec=pltpu.PrefetchScalarGridSpec(
                num_scalar_prefetch=0,
                grid=(n_row_tiles,),
                in_specs=[
                    pl.BlockSpec((tm, dim), lambda i: (i, 0)),       # x rows
                    pl.BlockSpec((1, dim), lambda i: (0, 0)),        # gamma
                    pl.BlockSpec((1, dim), lambda i: (0, 0)),        # beta
                    pl.BlockSpec((dim, hidden), lambda i: (0, 0)),   # W1
                    pl.BlockSpec((1, hidden), lambda i: (0, 0)),     # b1
                    pl.BlockSpec((hidden, dim), lambda i: (0, 0)),   # W2
                    pl.BlockSpec((1, dim), lambda i: (0, 0)),        # b2
                ],
                out_specs=pl.BlockSpec((tm, dim), lambda i: (i, 0)),
            ),
            compiler_params=pltpu.CompilerParams(
                dimension_semantics=("parallel",),
                vmem_limit_bytes=budget,
            ),
            cost_estimate=cost,
        )(x2, gamma2, beta2, w1, b1_2, w2, b2_2)
        return out.reshape(orig_shape)

    # ---- streamed: hidden dim tiled along an inner "arbitrary" grid axis ----
    hidden_pad = int(pl.cdiv(hidden, th)) * th
    if hidden_pad != hidden:
        pad = hidden_pad - hidden
        # Zero-padded hidden units are exact no-ops: GELU(0)=0 and the padded
        # W2 rows are zero, so they contribute nothing to the output.
        w1 = jnp.pad(w1, ((0, 0), (0, pad)))
        b1 = jnp.pad(b1, ((0, pad),))
        w2 = jnp.pad(w2, ((0, pad), (0, 0)))
    n_h = hidden_pad // th
    b1_2 = b1.reshape(1, hidden_pad)

    cost = pl.CostEstimate(
        flops=int(4 * n_rows * dim * hidden_pad
                  + 18 * n_rows * (dim + hidden_pad)),
        transcendentals=int(n_rows * hidden_pad),
        bytes_accessed=int(2 * n_rows * dim * x_item
                           + 2 * n_row_tiles * dim * hidden_pad * w_item
                           + (3 * dim + hidden_pad) * w_item),
    )

    out = pl.pallas_call(
        functools.partial(_ffn_streamed_kernel, eps=eps),
        out_shape=jax.ShapeDtypeStruct((n_rows, dim), x.dtype),
        grid_spec=pltpu.PrefetchScalarGridSpec(
            num_scalar_prefetch=0,
            grid=(n_row_tiles, n_h),
            in_specs=[
                pl.BlockSpec((tm, dim), lambda i, j: (i, 0)),       # x rows
                pl.BlockSpec((1, dim), lambda i, j: (0, 0)),        # gamma
                pl.BlockSpec((1, dim), lambda i, j: (0, 0)),        # beta
                pl.BlockSpec((dim, th), lambda i, j: (0, j)),       # W1 chunk
                pl.BlockSpec((1, th), lambda i, j: (0, j)),         # b1 chunk
                pl.BlockSpec((th, dim), lambda i, j: (j, 0)),       # W2 chunk
                pl.BlockSpec((1, dim), lambda i, j: (0, 0)),        # b2
            ],
            out_specs=pl.BlockSpec((tm, dim), lambda i, j: (i, 0)),
            scratch_shapes=[
                pltpu.VMEM((tm, dim), w1.dtype),      # cached LayerNorm rows
                pltpu.VMEM((tm, dim), jnp.float32),   # f32 output accumulator
            ],
        ),
        compiler_params=pltpu.CompilerParams(
            dimension_semantics=("parallel", "arbitrary"),
            vmem_limit_bytes=budget,
        ),
        cost_estimate=cost,
    )(x2, gamma2, beta2, w1, b1_2, w2, b2_2)
    return out.reshape(orig_shape)


# ---------------------------------------------------------------------------
# Reference & demo
# ---------------------------------------------------------------------------

def _reference(x, gamma, beta, w1, b1, w2, b2, eps=1e-5):
    xf = x.astype(jnp.float32)
    mean = jnp.mean(xf, -1, keepdims=True)
    var = jnp.mean((xf - mean) ** 2, -1, keepdims=True)
    xn = (xf - mean) / jnp.sqrt(var + eps) * gamma + beta
    h = xn @ w1 + b1
    h = 0.5 * h * (1.0 + jax.lax.erf(h / jnp.sqrt(2.0)))
    y = h @ w2 + b2
    return y.astype(x.dtype)


if __name__ == "__main__":
    key = jax.random.PRNGKey(0)

    # --- Test 1: small shapes consistent with the module (single-pass path) ---
    B, S, D, H = 2, 8, 32, 64
    keys = jax.random.split(key, 8)
    x = jax.random.normal(keys[0], (B, S, D), dtype=jnp.float32)
    gamma = 1.0 + 0.1 * jax.random.normal(keys[1], (D,), dtype=jnp.float32)
    beta = 0.1 * jax.random.normal(keys[2], (D,), dtype=jnp.float32)
    # PyTorch Linear stores weight as (out, in); kernel uses (in, out).
    w1 = jax.random.normal(keys[3], (D, H), dtype=jnp.float32) / jnp.sqrt(D)
    b1 = 0.05 * jax.random.normal(keys[4], (H,), dtype=jnp.float32)
    w2 = jax.random.normal(keys[5], (H, D), dtype=jnp.float32) / jnp.sqrt(H)
    b2 = 0.05 * jax.random.normal(keys[6], (D,), dtype=jnp.float32)

    out = jax.block_until_ready(feedforward_pallas(x, gamma, beta, w1, b1, w2, b2))
    ref = _reference(x, gamma, beta, w1, b1, w2, b2)
    assert out.shape == x.shape and out.dtype == x.dtype
    assert jnp.allclose(out, ref, atol=1e-4, rtol=1e-4), \
        float(jnp.max(jnp.abs(out - ref)))

    # --- Test 2: streamed + zero-padded path (hidden % 128 != 0, >1 row tile) ---
    B2, S2, D2, H2 = 2, 160, 128, 320
    k2 = jax.random.split(keys[7], 7)
    x_l = jax.random.normal(k2[0], (B2, S2, D2), dtype=jnp.float32)
    gamma_l = 1.0 + 0.1 * jax.random.normal(k2[1], (D2,), dtype=jnp.float32)
    beta_l = 0.1 * jax.random.normal(k2[2], (D2,), dtype=jnp.float32)
    w1_l = jax.random.normal(k2[3], (D2, H2), dtype=jnp.float32) / jnp.sqrt(D2)
    b1_l = 0.05 * jax.random.normal(k2[4], (H2,), dtype=jnp.float32)
    w2_l = jax.random.normal(k2[5], (H2, D2), dtype=jnp.float32) / jnp.sqrt(H2)
    b2_l = 0.05 * jax.random.normal(k2[6], (D2,), dtype=jnp.float32)

    out_l = jax.block_until_ready(
        feedforward_pallas(x_l, gamma_l, beta_l, w1_l, b1_l, w2_l, b2_l,
                           tile_h=128))
    ref_l = _reference(x_l, gamma_l, beta_l, w1_l, b1_l, w2_l, b2_l)
    assert jnp.allclose(out_l, ref_l, atol=1e-4, rtol=1e-4), \
        float(jnp.max(jnp.abs(out_l - ref_l)))

    print("KERNEL_OK")
</pallas_src>

<mosaic_0001>
module attributes {stable_mosaic.version = 11 : i64} {
  func.func @_ffn_single_kernel(%arg0: i32, %arg1: memref<16x32xf32, #tpu.memory_space<vmem>>, %arg2: memref<1x32xf32, #tpu.memory_space<vmem>>, %arg3: memref<1x32xf32, #tpu.memory_space<vmem>>, %arg4: memref<32x64xf32, #tpu.memory_space<vmem>>, %arg5: memref<1x64xf32, #tpu.memory_space<vmem>>, %arg6: memref<64x32xf32, #tpu.memory_space<vmem>>, %arg7: memref<1x32xf32, #tpu.memory_space<vmem>>, %arg8: memref<16x32xf32, #tpu.memory_space<vmem>>) attributes {dimension_semantics = [#tpu.dimension_semantics<parallel>], iteration_bounds = array<i64: 1>, scalar_prefetch = 0 : i64, scratch_operands = 0 : i64, tpu.core_type = #tpu.core_type<tc>, window_params = [{transform_indices = @transform_0, window_bounds = array<i64: 16, 32>}, {pipeline_mode = #tpu.pipeline_mode<synchronous>, transform_indices = @transform_1, window_bounds = array<i64: 1, 32>}, {pipeline_mode = #tpu.pipeline_mode<synchronous>, transform_indices = @transform_2, window_bounds = array<i64: 1, 32>}, {pipeline_mode = #tpu.pipeline_mode<synchronous>, transform_indices = @transform_3, window_bounds = array<i64: 32, 64>}, {pipeline_mode = #tpu.pipeline_mode<synchronous>, transform_indices = @transform_4, window_bounds = array<i64: 1, 64>}, {pipeline_mode = #tpu.pipeline_mode<synchronous>, transform_indices = @transform_5, window_bounds = array<i64: 64, 32>}, {pipeline_mode = #tpu.pipeline_mode<synchronous>, transform_indices = @transform_6, window_bounds = array<i64: 1, 32>}, {transform_indices = @transform_7, window_bounds = array<i64: 16, 32>}]} {
    %c0 = arith.constant 0 : index
    %c0_0 = arith.constant 0 : index
    %0 = vector.load %arg1[%c0, %c0_0] : memref<16x32xf32, #tpu.memory_space<vmem>>, vector<16x32xf32>
    %cst = arith.constant dense<0.000000e+00> : vector<16xf32>
    %1 = vector.multi_reduction <add>, %0, %cst [1] : vector<16x32xf32> to vector<16xf32>
    %2 = vector.shape_cast %1 : vector<16xf32> to vector<16x1xf32>
    %cst_1 = arith.constant 3.200000e+01 : f32
    %3 = vector.broadcast %cst_1 : f32 to vector<16x1xf32>
    %4 = arith.divf %2, %3 : vector<16x1xf32>
    %5 = vector.broadcast %4 : vector<16x1xf32> to vector<16x32xf32>
    %6 = arith.subf %0, %5 : vector<16x32xf32>
    %7 = arith.mulf %6, %6 : vector<16x32xf32>
    %cst_2 = arith.constant dense<0.000000e+00> : vector<16xf32>
    %8 = vector.multi_reduction <add>, %7, %cst_2 [1] : vector<16x32xf32> to vector<16xf32>
    %9 = vector.shape_cast %8 : vector<16xf32> to vector<16x1xf32>
    %cst_3 = arith.constant 3.200000e+01 : f32
    %10 = vector.broadcast %cst_3 : f32 to vector<16x1xf32>
    %11 = arith.divf %9, %10 : vector<16x1xf32>
    %cst_4 = arith.constant 9.99999974E-6 : f32
    %12 = vector.broadcast %cst_4 : f32 to vector<16x1xf32>
    %13 = arith.addf %11, %12 : vector<16x1xf32>
    %14 = math.rsqrt %13 : vector<16x1xf32>
    %15 = vector.broadcast %14 : vector<16x1xf32> to vector<16x32xf32>
    %16 = arith.mulf %6, %15 : vector<16x32xf32>
    %c0_5 = arith.constant 0 : index
    %c0_6 = arith.constant 0 : index
    %17 = vector.load %arg2[%c0_5, %c0_6] : memref<1x32xf32, #tpu.memory_space<vmem>>, vector<1x32xf32>
    %18 = vector.broadcast %17 : vector<1x32xf32> to vector<16x32xf32>
    %19 = arith.mulf %16, %18 : vector<16x32xf32>
    %c0_7 = arith.constant 0 : index
    %c0_8 = arith.constant 0 : index
    %20 = vector.load %arg3[%c0_7, %c0_8] : memref<1x32xf32, #tpu.memory_space<vmem>>, vector<1x32xf32>
    %21 = vector.broadcast %20 : vector<1x32xf32> to vector<16x32xf32>
    %22 = arith.addf %19, %21 : vector<16x32xf32>
    %c0_9 = arith.constant 0 : index
    %c0_10 = arith.constant 0 : index
    %23 = vector.load %arg4[%c0_9, %c0_10] : memref<32x64xf32, #tpu.memory_space<vmem>>, vector<32x64xf32>
    %cst_11 = arith.constant dense<0.000000e+00> : vector<16x64xf32>
    %24 = tpu.matmul %22, %23, %cst_11 {dimension_numbers = #tpu.dot_dimension_numbers<[1], [0], [0], [1], [0, 0, 1, 1], [], []>} : vector<16x32xf32>, vector<32x64xf32>, vector<16x64xf32> -> vector<16x64xf32>
    %c0_12 = arith.constant 0 : index
    %c0_13 = arith.constant 0 : index
    %25 = vector.load %arg5[%c0_12, %c0_13] : memref<1x64xf32, #tpu.memory_space<vmem>>, vector<1x64xf32>
    %26 = vector.broadcast %25 : vector<1x64xf32> to vector<16x64xf32>
    %27 = arith.addf %24, %26 : vector<16x64xf32>
    %cst_14 = arith.constant 5.000000e-01 : f32
    %28 = vector.broadcast %cst_14 : f32 to vector<16x64xf32>
    %29 = arith.mulf %28, %27 : vector<16x64xf32>
    %cst_15 = arith.constant 0.707106769 : f32
    %30 = vector.broadcast %cst_15 : f32 to vector<16x64xf32>
    %31 = arith.mulf %27, %30 : vector<16x64xf32>
    %32 = math.erf %31 : vector<16x64xf32>
    %cst_16 = arith.constant 1.000000e+00 : f32
    %33 = vector.broadcast %cst_16 : f32 to vector<16x64xf32>
    %34 = arith.addf %33, %32 : vector<16x64xf32>
    %35 = arith.mulf %29, %34 : vector<16x64xf32>
    %c0_17 = arith.constant 0 : index
    %c0_18 = arith.constant 0 : index
    %36 = vector.load %arg6[%c0_17, %c0_18] : memref<64x32xf32, #tpu.memory_space<vmem>>, vector<64x32xf32>
    %cst_19 = arith.constant dense<0.000000e+00> : vector<16x32xf32>
    %37 = tpu.matmul %35, %36, %cst_19 {dimension_numbers = #tpu.dot_dimension_numbers<[1], [0], [0], [1], [0, 0, 1, 1], [], []>} : vector<16x64xf32>, vector<64x32xf32>, vector<16x32xf32> -> vector<16x32xf32>
    %c0_20 = arith.constant 0 : index
    %c0_21 = arith.constant 0 : index
    %38 = vector.load %arg7[%c0_20, %c0_21] : memref<1x32xf32, #tpu.memory_space<vmem>>, vector<1x32xf32>
    %39 = vector.broadcast %38 : vector<1x32xf32> to vector<16x32xf32>
    %40 = arith.addf %37, %39 : vector<16x32xf32>
    %c0_22 = arith.constant 0 : index
    %c0_23 = arith.constant 0 : index
    %41 = vector.load %arg8[%c0_22, %c0_23] : memref<16x32xf32, #tpu.memory_space<vmem>>, vector<16x32xf32>
    tpu.vector_store %arg8[%c0_22, %c0_23], %40 {strides = array<i32>} : memref<16x32xf32, #tpu.memory_space<vmem>>, vector<16x32xf32>,
    return
  }
  func.func @transform_0(%arg0: i32) -> (i32, i32) {
    %c0_i32 = arith.constant 0 : i32
    %c0_i32_0 = arith.constant 0 : i32
    return %arg0, %c0_i32 : i32, i32
  }
  func.func @transform_1(%arg0: i32) -> (i32, i32) {
    %c0_i32 = arith.constant 0 : i32
    %c0_i32_0 = arith.constant 0 : i32
    %c0_i32_1 = arith.constant 0 : i32
    return %c0_i32, %c0_i32_0 : i32, i32
  }
  func.func @transform_2(%arg0: i32) -> (i32, i32) {
    %c0_i32 = arith.constant 0 : i32
    %c0_i32_0 = arith.constant 0 : i32
    %c0_i32_1 = arith.constant 0 : i32
    return %c0_i32, %c0_i32_0 : i32, i32
  }
  func.func @transform_3(%arg0: i32) -> (i32, i32) {
    %c0_i32 = arith.constant 0 : i32
    %c0_i32_0 = arith.constant 0 : i32
    %c0_i32_1 = arith.constant 0 : i32
    return %c0_i32, %c0_i32_0 : i32, i32
  }
  func.func @transform_4(%arg0: i32) -> (i32, i32) {
    %c0_i32 = arith.constant 0 : i32
    %c0_i32_0 = arith.constant 0 : i32
    %c0_i32_1 = arith.constant 0 : i32
    return %c0_i32, %c0_i32_0 : i32, i32
  }
  func.func @transform_5(%arg0: i32) -> (i32, i32) {
    %c0_i32 = arith.constant 0 : i32
    %c0_i32_0 = arith.constant 0 : i32
    %c0_i32_1 = arith.constant 0 : i32
    return %c0_i32, %c0_i32_0 : i32, i32
  }
  func.func @transform_6(%arg0: i32) -> (i32, i32) {
    %c0_i32 = arith.constant 0 : i32
    %c0_i32_0 = arith.constant 0 : i32
    %c0_i32_1 = arith.constant 0 : i32
    return %c0_i32, %c0_i32_0 : i32, i32
  }
  func.func @transform_7(%arg0: i32) -> (i32, i32) {
    %c0_i32 = arith.constant 0 : i32
    %c0_i32_0 = arith.constant 0 : i32
    return %arg0, %c0_i32 : i32, i32
  }
}

</mosaic_0001>

<bundles_post_ra>
// kernel: tpu_custom_call.1
= control target key start
LH: loop header
LB: loop body
LE: loop exit
PB: predicated region body
PF: predicated region fallthrough
CT: control target
= control target key end

     0   :  { %vm29_vm0 = vcmask 261120   ;;  %s522_s0 = inlined_call_operand.vmem [shape: f32[16,32], index: 0, kind: input, shape index: {}]   ;;  %s523_s1 = inlined_call_operand.vmem [shape: f32[1,32], index: 1, kind: input, shape index: {}]   ;;  %s524_s2 = inlined_call_operand.vmem [shape: f32[1,32], index: 2, kind: input, shape index: {}]   ;;  %s525_s3 = inlined_call_operand.vmem [shape: f32[32,64], index: 3, kind: input, shape index: {}]   ;;  %s526_s4 = inlined_call_operand.vmem [shape: f32[1,64], index: 4, kind: input, shape index: {}]   ;;  %s527_s5 = inlined_call_operand.vmem [shape: f32[64,32], index: 5, kind: input, shape index: {}]   ;;  %s528_s6 = inlined_call_operand.vmem [shape: f32[1,32], index: 6, kind: input, shape index: {}]   ;;  %s529_s7 = inlined_call_operand.hbm [shape: f32[16,32], index: 7, kind: output, shape index: {}]  }
   0x1   :  { %v27_v0 = vld [vmem:[%s522_s0] sm:$0xff]  ;;  %v28_v1 = vld [vmem:[%s522_s0 + $0x8] sm:$0xff] }
   0x2   :  { %12 = vsyncpa [#allocation3], 0  ;;  %v30_v2 = vsel %vm29_vm0, %v27_v0, 0.0  ;;  %v33_v3 = vsel %vm29_vm0, %v28_v1, 0.0  ;;  %v75_v14 = vld [vmem:[%s525_s3] sm:$0xff]  ;;  %v76_v15 = vld [vmem:[%s525_s3 + $0x8] sm:$0xff] }
   0x3   :  { %31 = vadd.xlane.f32.xlu0 %v30_v2  ;;  %v77_v16 = vld [vmem:[%s525_s3 + $0x10] sm:$0xff]  ;;  %v346_v17 = vpack.c.bf16 %v76_v15, %v75_v14  ;;  %v78_v18 = vld [vmem:[%s525_s3 + $0x18] sm:$0xff]  ;;  %v292_v27 = vld [vmem:[%s523_s1] ss:$0 sm:$0xff]  ;;  %vm192_vm1 = vcmask 523264   ;;  %s405_s30 = smov [#allocation2]  }
   0x4   :  { %v350_v19 = vpack.c.bf16 %v78_v18, %v77_v16  ;;  %v293_v29 = vld [vmem:[%s524_s2] ss:$0 sm:$0xff]  ;;  %v178_v37 = vld [vmem:[%s527_s5 + $0x8] sm:$0xff]  ;;  %v179_v39 = vld [vmem:[%s527_s5 + $0x10] sm:$0xff]  ;;  %s281_s8 = sshll.u32 %s405_s30, 4  ;;  %s282_s8 = int_to_ptr.vmem [resolvable:$true] %s281_s8 }
   0x5   :  { %347 = vmatprep.subr.bf16.mxu0 %v346_v17  ;;  %v177_v36 = vld [vmem:[%s527_s5] sm:$0xff]  ;;  %v180_v40 = vld [vmem:[%s527_s5 + $0x18] sm:$0xff]  ;;  %v182_v43 = vld [vmem:[%s527_s5 + $0x28] sm:$0xff]  ;;  %s381_s9 = scalar_lea.vmem %s282_s8, 256  ;;  %p386_p1 = scmp.lt.s32.totalorder %s282_s8, %s282_s8 }
   0x6   :  { %349 = vmatpush3.bf16.msra.mxu0 %v346_v17  ;;  %v354_v38 = vpack.c.bf16 %v178_v37, %v177_v36  ;;  %v358_v41 = vpack.c.bf16 %v180_v40, %v179_v39  ;;  %v181_v42 = vld [vmem:[%s527_s5 + $0x20] sm:$0xff]  ;;  %v183_v45 = vld [vmem:[%s527_s5 + $0x30] sm:$0xff]  ;;  %v184_v46 = vld [vmem:[%s527_s5 + $0x38] sm:$0xff]  ;;  %p382_p0 = scmp.ne.s32.totalorder %s282_s8, %s381_s9  ;;  %p387_p2 = scmp.lt.s32.totalorder %s381_s9, %s381_s9 }
   0x7   :  { %34 = vadd.xlane.f32.xlu0 %v33_v3  ;;  %351 = vmatprep.subr.bf16.mxu0 %v350_v19  ;;  %v362_v44 = vpack.c.bf16 %v182_v43, %v181_v42  ;;  %v366_v47 = vpack.c.bf16 %v184_v46, %v183_v45  ;;  %v294_v48 = vld [vmem:[%s526_s4] ss:$0 sm:$0xff] }
   0x8   :  { %355 = vmatprep.subr.bf16.mxu1 %v354_v38  ;;  %v297_v63 = vld [vmem:[%s528_s6] ss:$0 sm:$0xff]  ;;  %p388_p3 = por %p387_p2, %p386_p1 }
   0x9   :  { %357 = vmatpush3.bf16.msra.mxu1 %v354_v38 }
   0xa   :  { %353 = vmatpush3.bf16.msra.mxu0 %v350_v19  ;;  %359 = vmatprep.subr.bf16.mxu1 %v358_v41  ;;  %p389_p4 = pnand %p388_p3, %p382_p0 }
   0xd   :  { %361 = vmatpush3.bf16.msra.mxu1 %v358_v41 }
   0xe   :  { %363 = vmatprep.subr.bf16.mxu1 %v362_v44 }
  0x11   :  { %365 = vmatpush3.bf16.msra.mxu1 %v362_v44 }
  0x12   :  { %367 = vmatprep.subr.bf16.mxu1 %v366_v47 }
  0x15   :  { %369 = vmatpush3.bf16.msra.mxu1 %v366_v47 }
  0x90   :  { %v32_v4 = vpop.xlane.xlu0 %31 }
  0x91   :  { %v37_v5 = vmul.f32 0.03125, %v32_v4 }
  0x93   :  { %v39_v6 = vsub.f32 %v27_v0, %v37_v5 }
  0x94   :  { %v35_v7 = vpop.xlane.xlu0 %34 }
  0x95   :  { %v38_v8 = vmul.f32 0.03125, %v35_v7  ;;  %v41_v9 = vmul.f32 %v39_v6, %v39_v6 }
  0x97   :  { %v40_v10 = vsub.f32 %v28_v1, %v38_v8  ;;  %v43_v11 = vsel %vm29_vm0, %v41_v9, 0.0 }
  0x98   :  { %44 = vadd.xlane.f32.xlu1 %v43_v11 }
  0x99   :  { %v42_v12 = vmul.f32 %v40_v10, %v40_v10 }
  0x9b   :  { %v46_v13 = vsel %vm29_vm0, %v42_v12, 0.0 }
  0x9c   :  { %47 = vadd.xlane.f32.xlu1 %v46_v13 }
 0x125   :  { %v45_v20 = vpop.xlane.xlu1 %44 }
 0x126   :  { %v49_v21 = vmul.f32 0.03125, %v45_v20 }
 0x128   :  { %v51_v22 = vadd.f32 1e-05, %v49_v21 }
 0x129   :  { %v48_v23 = vpop.xlane.xlu1 %47 }
 0x12a   :  { %373 = vrsqrt.f32 %v51_v22  ;;  %v50_v24 = vmul.f32 0.03125, %v48_v23 }
 0x12c   :  { %v52_v25 = vadd.f32 1e-05, %v50_v24 }
 0x12e   :  { %375 = vrsqrt.f32 %v52_v25 }
 0x134   :  { %v374_v26 = vpop.eup %373 }
 0x135   :  { %v55_v28 = vmul.f32 %v374_v26, %v39_v6 }
 0x137   :  { %v64_v30 = vmul.f32 %v292_v27, %v55_v28 }
 0x138   :  { %v376_v31 = vpop.eup %375 }
 0x139   :  { %v56_v32 = vmul.f32 %v376_v31, %v40_v10  ;;  %v73_v33 = vadd.f32 %v293_v29, %v64_v30 }
 0x13b   :  { %v65_v34 = vmul.f32 %v292_v27, %v56_v32  ;;  %324 = vmatprep.mubr.msk.f32.mxu0 %vm29_vm0, %v73_v33 }
 0x13d   :  { %v74_v35 = vadd.f32 %v293_v29, %v65_v34 }
 0x13f   :  { %325 = vmatmul.mubr.msk.f32.vlgmr.msra.gmra.mrb[0].mxu0 %vm29_vm0, %v74_v35 }
 0x212   :  { %v326_v49 = vpop.f32.mrb[0].mxu0 }
 0x213   :  { %v164_v50 = vadd.f32 %v326_v49, %v294_v48  ;;  %v158_v51 = vpop.f32.mrb[1].mxu0 }
 0x214   :  { %v159_v52 = vadd.f32 %v294_v48, %v158_v51 }
 0x215   :  { %v170_v53 = vmul.f32 0.70710677, %v164_v50  ;;  %v168_v60 = vmul.f32 0.5, %v164_v50 }
 0x216   :  { %v169_v54 = vmul.f32 0.70710677, %v159_v52  ;;  %v167_v58 = vmul.f32 0.5, %v159_v52 }
 0x217   :  { %377 = verf.f32 %v170_v53 }
 0x218   :  { %379 = verf.f32 %v169_v54 }
 0x221   :  { %v378_v55 = vpop.eup %377 }
 0x222   :  { %v380_v56 = vpop.eup %379  ;;  %v174_v57 = vadd.f32 1.0, %v378_v55 }
 0x223   :  { %v173_v59 = vadd.f32 1.0, %v380_v56 }
 0x224   :  { %v176_v62 = vmul.f32 %v174_v57, %v168_v60 }
 0x225   :  { %v175_v61 = vmul.f32 %v173_v59, %v167_v58 }
 0x227   :  { %343 = vmatprep.mubr.msk.f32.mxu1 %vm192_vm1, %v175_v61 }
 0x228   :  { %344 = vmatmul.mubr.msk.f32.vlgmr.msra.gmra.mrb[0].mxu1 %vm192_vm1, %v176_v62 }
 0x2fb   :  { %v345_v0 = vpop.f32.mrb[0].mxu1 }
 0x2fc   :  { %v271_v1 = vadd.f32 %v345_v0, %v297_v63  ;;  %v265_v2 = vpop.f32.mrb[1].mxu1 }
 0x2fd   :  { %v266_v3 = vadd.f32 %v297_v63, %v265_v2 }
 0x2fe   :  { %275 = vst.msk [vmem:[#allocation2 + $0x8] sm:$0xff] %vm29_vm0, %v271_v1 }
 0x2ff   :  { %274 = vst.msk [vmem:[#allocation2] sm:$0xff] %vm29_vm0, %v266_v3 }
 0x300   :  { %392 = shalt.err (!%p389_p4)
}
 0x301   :  { %s393_s11 = scalar_lea.hbm %s529_s7, 256 }
 0x302   :  { %p394_p5 = scmp.ne.s32.totalorder %s529_s7, %s393_s11  ;;  %p397_p6 = scmp.lt.u32.totalorder %s393_s11, %s529_s7 }
 0x304   :  { %p399_p7 = pnand %p397_p6, %p394_p5 }
 0x306   :  { %402 = shalt.err (!%p399_p7)
}
 0x307   :  { %s406_s15 = smov 128   ;;  %s407_s16 = smov 8  }
 0x308   :  { %287 = dma.vmem_to_hbm [thread:$0]  %s282_s8, 256, %s529_s7, [#allocation3], %s406_s15, %s406_s15, %s407_s16  }
 0x309   :  { %403 = dma.done.wait [#allocation3], 256  }
 0x30a   :  { %404 = vsyncadd [#allocation3], 4294967040 }
 0x30b   :  { %291 = vsyncpa [#allocation3], 1 }

</bundles_post_ra>
